<compile_context>
chip_gen: v6e
topology: v6e:2x2x1
jax: 0.10.0
libtpu: 0.0.40
codegen_flags: <defaults>
</compile_context>

<pallas_src>
import jax
import jax.numpy as jnp
from jax import lax
from jax.experimental import pallas as pl
from jax.experimental.pallas import tpu as pltpu


def gcn_kernel(adj_ref, x_ref, w_ref, b_ref, o_ref):
    # adj_ref: (gb, N, N) any dtype (nonzero => edge)
    # x_ref:   (gb, N, F_in) f32
    # w_ref:   (F_in, F_pad) f32    b_ref: (1, F_pad) f32
    # o_ref:   (gb, N, F_pad) f32
    gb, n, _ = adj_ref.shape

    # Self-loop mask and ones column built once per grid step (graph independent).
    diag = (lax.broadcasted_iota(jnp.int32, (n, n), 0)
            == lax.broadcasted_iota(jnp.int32, (n, n), 1))
    ones_col = jnp.ones((n, 1), dtype=jnp.float32)

    aggs = []
    for g in range(gb):  # gb is a small static constant -> fully unrolled
        # Binarize in-kernel (edge_index = adj.nonzero()) and force self loops,
        # matching GCNConv(add_self_loops=True) regardless of diag(adj).
        a_hat = jnp.where(diag, 1.0, (adj_ref[g] != 0).astype(jnp.float32))  # (N, N)

        # Column degree on the MXU, produced directly as an (N, 1) column:
        # deg[i] = sum_j A_hat[j, i].  deg >= 1 (self loop) -> rsqrt needs no guard.
        deg = lax.dot_general(a_hat, ones_col,
                              dimension_numbers=(((0,), (0,)), ((), ())),
                              preferred_element_type=jnp.float32)            # (N, 1)
        dinv = lax.rsqrt(deg)

        # Aggregate before the feature transform (F_in << F_pad):
        #   agg = dinv ⊙ (A_hat^T @ (dinv ⊙ X))
        xs = x_ref[g] * dinv                                                 # (N, F_in)
        agg = lax.dot_general(a_hat, xs,
                              dimension_numbers=(((0,), (0,)), ((), ())),
                              preferred_element_type=jnp.float32)            # A_hat^T @ xs
        aggs.append(agg * dinv)

    # One feature transform for every graph in this grid step.
    agg_all = aggs[0] if gb == 1 else jnp.concatenate(aggs, axis=0)          # (gb*N, F_in)
    out_flat = jnp.dot(agg_all, w_ref[...],
                       preferred_element_type=jnp.float32) + b_ref[...]      # (gb*N, F_pad)
    for g in range(gb):
        o_ref[g] = out_flat[g * n:(g + 1) * n, :]


def prepare_params(w_t, bias):
    """One-time parameter prep (do this at load time, not per forward).

    w_t:  (F_in, F_out) f32 (PyTorch weight pre-transposed)
    bias: (F_out,) f32
    Returns lane-padded (F_in, F_pad) weight and (1, F_pad) bias, F_pad % 128 == 0.
    """
    f_in, f_out = w_t.shape
    f_pad = ((f_out + 127) // 128) * 128
    w_pad = jnp.pad(w_t.astype(jnp.float32), ((0, 0), (0, f_pad - f_out)))
    b_pad = jnp.pad(jnp.reshape(bias.astype(jnp.float32), (1, f_out)),
                    ((0, 0), (0, f_pad - f_out)))
    return w_pad, b_pad


def global_layer(x, adj, w_pad, b_pad):
    """Batched GCNConv forward.

    x:     (B, N, F_in)  float32
    adj:   (B, N, N)     any dtype; nonzero entries are edges (binarized in-kernel)
    w_pad: (F_in, F_pad) float32  (from prepare_params)
    b_pad: (1, F_pad)    float32  (from prepare_params)
    Returns the lane-padded (B, N, F_pad) output; real features are [..., :F_out].
    """
    b, n, f_in = x.shape
    f_pad = w_pad.shape[1]

    # At most two grid steps over the whole batch: two so v7x's dual TensorCores
    # both get work; on single-TC v5e/v6e the extra step is ~0.35 us.
    num_steps = 2 if (b % 2 == 0 and b >= 2) else 1
    gb = b // num_steps

    return pl.pallas_call(
        gcn_kernel,
        out_shape=jax.ShapeDtypeStruct((b, n, f_pad), jnp.float32),
        grid=(num_steps,),
        in_specs=[
            pl.BlockSpec((gb, n, n), lambda i: (i, 0, 0)),
            pl.BlockSpec((gb, n, f_in), lambda i: (i, 0, 0)),
            pl.BlockSpec((f_in, f_pad), lambda i: (0, 0)),
            pl.BlockSpec((1, f_pad), lambda i: (0, 0)),
        ],
        out_specs=pl.BlockSpec((gb, n, f_pad), lambda i: (i, 0, 0)),
        compiler_params=pltpu.CompilerParams(
            dimension_semantics=("parallel",)),
    )(adj, x, w_pad, b_pad)


def global_layer_ref(x, adj, w_t, bias):
    """Pure-JAX reference (batched) for correctness checking."""
    bias2 = jnp.reshape(bias, (1, -1))

    def one(xg, ag):
        n = ag.shape[0]
        a_hat = jnp.where(jnp.eye(n, dtype=bool), 1.0, (ag != 0).astype(jnp.float32))
        deg = a_hat.sum(axis=0)
        dinv = 1.0 / jnp.sqrt(deg)
        s = a_hat * dinv[:, None] * dinv[None, :]
        return s.T @ (xg @ w_t) + bias2

    return jax.vmap(one)(x, adj)


if __name__ == "__main__":
    # Small shapes implied by the forward: B graphs, N nodes, in -> out features.
    B, N, F_IN, F_OUT = 4, 16, 8, 32

    key = jax.random.PRNGKey(0)
    kx, kmask, kval, kw, kb = jax.random.split(key, 5)

    x = jax.random.normal(kx, (B, N, F_IN), dtype=jnp.float32)
    # Sparse-ish adjacency with arbitrary nonzero edge values (kernel binarizes
    # in-kernel) and possibly-nonzero diagonal (kernel forces self loops).
    mask = jax.random.uniform(kmask, (B, N, N)) < 0.25
    adj = jnp.where(mask, jax.random.uniform(kval, (B, N, N)), 0.0).astype(jnp.float32)

    # GCNConv parameters (PyTorch stores W as (out, in); kept pre-transposed here).
    w_t = jax.random.normal(kw, (F_IN, F_OUT), dtype=jnp.float32) * (1.0 / jnp.sqrt(F_IN))
    bias = jax.random.normal(kb, (F_OUT,), dtype=jnp.float32) * 0.01

    # Parameter padding done once, outside the per-call path.
    w_pad, b_pad = prepare_params(w_t, bias)

    fwd = jax.jit(global_layer)
    out_pad = jax.block_until_ready(fwd(x, adj, w_pad, b_pad))
    # Slice back to F_out only at the point of use (consumers may keep the
    # 128-lane-padded form to avoid this copy).
    out = out_pad[:, :, :F_OUT]

    ref = global_layer_ref(x, adj, w_t, bias)
    assert out.shape == (B, N, F_OUT)
    assert jnp.allclose(out, ref, atol=1e-4, rtol=1e-4)
    print("KERNEL_OK")
</pallas_src>

<mosaic_0001>
module attributes {stable_mosaic.version = 11 : i64} {
  func.func @gcn_kernel(%arg0: i32, %arg1: memref<2x16x16xf32, #tpu.memory_space<vmem>>, %arg2: memref<2x16x8xf32, #tpu.memory_space<vmem>>, %arg3: memref<8x128xf32, #tpu.memory_space<vmem>>, %arg4: memref<1x128xf32, #tpu.memory_space<vmem>>, %arg5: memref<2x16x128xf32, #tpu.memory_space<vmem>>) attributes {dimension_semantics = [#tpu.dimension_semantics<parallel>], iteration_bounds = array<i64: 2>, scalar_prefetch = 0 : i64, scratch_operands = 0 : i64, tpu.core_type = #tpu.core_type<tc>, window_params = [{transform_indices = @transform_0, window_bounds = array<i64: 2, 16, 16>}, {transform_indices = @transform_1, window_bounds = array<i64: 2, 16, 8>}, {pipeline_mode = #tpu.pipeline_mode<synchronous>, transform_indices = @transform_2, window_bounds = array<i64: 8, 128>}, {pipeline_mode = #tpu.pipeline_mode<synchronous>, transform_indices = @transform_3, window_bounds = array<i64: 1, 128>}, {transform_indices = @transform_4, window_bounds = array<i64: 2, 16, 128>}]} {
    %0 = tpu.iota {dimensions = array<i32: 0>} : vector<16x16xi32>
    %1 = tpu.iota {dimensions = array<i32: 1>} : vector<16x16xi32>
    %2 = arith.cmpi eq, %0, %1 : vector<16x16xi32>
    %cst = arith.constant 1.000000e+00 : f32
    %3 = vector.broadcast %cst : f32 to vector<16x1xf32>
    %c0 = arith.constant 0 : index
    %c0_0 = arith.constant 0 : index
    %c0_1 = arith.constant 0 : index
    %4 = vector.load %arg1[%c0, %c0_0, %c0_1] : memref<2x16x16xf32, #tpu.memory_space<vmem>>, vector<1x16x16xf32>
    %5 = vector.shape_cast %4 : vector<1x16x16xf32> to vector<16x16xf32>
    %cst_2 = arith.constant 0.000000e+00 : f32
    %6 = vector.broadcast %cst_2 : f32 to vector<16x16xf32>
    %7 = arith.cmpf one, %5, %6 : vector<16x16xf32>
    %8 = arith.extui %7 : vector<16x16xi1> to vector<16x16xi32>
    %9 = arith.sitofp %8 : vector<16x16xi32> to vector<16x16xf32>
    %cst_3 = arith.constant 1.000000e+00 : f32
    %10 = vector.broadcast %cst_3 : f32 to vector<16x16xf32>
    %11 = arith.select %2, %10, %9 : vector<16x16xi1>, vector<16x16xf32>
    %cst_4 = arith.constant dense<0.000000e+00> : vector<16x1xf32>
    %12 = tpu.matmul %11, %3, %cst_4 {dimension_numbers = #tpu.dot_dimension_numbers<[0], [0], [1], [1], [0, 1, 1, 1], [], []>} : vector<16x16xf32>, vector<16x1xf32>, vector<16x1xf32> -> vector<16x1xf32>
    %13 = math.rsqrt %12 : vector<16x1xf32>
    %c0_5 = arith.constant 0 : index
    %c0_6 = arith.constant 0 : index
    %c0_7 = arith.constant 0 : index
    %14 = vector.load %arg2[%c0_5, %c0_6, %c0_7] : memref<2x16x8xf32, #tpu.memory_space<vmem>>, vector<1x16x8xf32>
    %15 = vector.shape_cast %14 : vector<1x16x8xf32> to vector<16x8xf32>
    %16 = vector.broadcast %13 : vector<16x1xf32> to vector<16x8xf32>
    %17 = arith.mulf %15, %16 : vector<16x8xf32>
    %cst_8 = arith.constant dense<0.000000e+00> : vector<16x8xf32>
    %18 = tpu.matmul %11, %17, %cst_8 {dimension_numbers = #tpu.dot_dimension_numbers<[0], [0], [1], [1], [0, 1, 1, 1], [], []>} : vector<16x16xf32>, vector<16x8xf32>, vector<16x8xf32> -> vector<16x8xf32>
    %19 = vector.broadcast %13 : vector<16x1xf32> to vector<16x8xf32>
    %20 = arith.mulf %18, %19 : vector<16x8xf32>
    %c1 = arith.constant 1 : index
    %c0_9 = arith.constant 0 : index
    %c0_10 = arith.constant 0 : index
    %21 = vector.load %arg1[%c1, %c0_9, %c0_10] : memref<2x16x16xf32, #tpu.memory_space<vmem>>, vector<1x16x16xf32>
    %22 = vector.shape_cast %21 : vector<1x16x16xf32> to vector<16x16xf32>
    %cst_11 = arith.constant 0.000000e+00 : f32
    %23 = vector.broadcast %cst_11 : f32 to vector<16x16xf32>
    %24 = arith.cmpf one, %22, %23 : vector<16x16xf32>
    %25 = arith.extui %24 : vector<16x16xi1> to vector<16x16xi32>
    %26 = arith.sitofp %25 : vector<16x16xi32> to vector<16x16xf32>
    %cst_12 = arith.constant 1.000000e+00 : f32
    %27 = vector.broadcast %cst_12 : f32 to vector<16x16xf32>
    %28 = arith.select %2, %27, %26 : vector<16x16xi1>, vector<16x16xf32>
    %cst_13 = arith.constant dense<0.000000e+00> : vector<16x1xf32>
    %29 = tpu.matmul %28, %3, %cst_13 {dimension_numbers = #tpu.dot_dimension_numbers<[0], [0], [1], [1], [0, 1, 1, 1], [], []>} : vector<16x16xf32>, vector<16x1xf32>, vector<16x1xf32> -> vector<16x1xf32>
    %30 = math.rsqrt %29 : vector<16x1xf32>
    %c1_14 = arith.constant 1 : index
    %c0_15 = arith.constant 0 : index
    %c0_16 = arith.constant 0 : index
    %31 = vector.load %arg2[%c1_14, %c0_15, %c0_16] : memref<2x16x8xf32, #tpu.memory_space<vmem>>, vector<1x16x8xf32>
    %32 = vector.shape_cast %31 : vector<1x16x8xf32> to vector<16x8xf32>
    %33 = vector.broadcast %30 : vector<16x1xf32> to vector<16x8xf32>
    %34 = arith.mulf %32, %33 : vector<16x8xf32>
    %cst_17 = arith.constant dense<0.000000e+00> : vector<16x8xf32>
    %35 = tpu.matmul %28, %34, %cst_17 {dimension_numbers = #tpu.dot_dimension_numbers<[0], [0], [1], [1], [0, 1, 1, 1], [], []>} : vector<16x16xf32>, vector<16x8xf32>, vector<16x8xf32> -> vector<16x8xf32>
    %36 = vector.broadcast %30 : vector<16x1xf32> to vector<16x8xf32>
    %37 = arith.mulf %35, %36 : vector<16x8xf32>
    %38 = tpu.concatenate %20, %37 in 0 : vector<16x8xf32>, vector<16x8xf32> -> vector<32x8xf32>
    %c0_18 = arith.constant 0 : index
    %c0_19 = arith.constant 0 : index
    %39 = vector.load %arg3[%c0_18, %c0_19] : memref<8x128xf32, #tpu.memory_space<vmem>>, vector<8x128xf32>
    %cst_20 = arith.constant dense<0.000000e+00> : vector<32x128xf32>
    %40 = tpu.matmul %38, %39, %cst_20 {dimension_numbers = #tpu.dot_dimension_numbers<[1], [0], [0], [1], [0, 0, 1, 1], [], []>} : vector<32x8xf32>, vector<8x128xf32>, vector<32x128xf32> -> vector<32x128xf32>
    %c0_21 = arith.constant 0 : index
    %c0_22 = arith.constant 0 : index
    %41 = vector.load %arg4[%c0_21, %c0_22] : memref<1x128xf32, #tpu.memory_space<vmem>>, vector<1x128xf32>
    %42 = vector.broadcast %41 : vector<1x128xf32> to vector<32x128xf32>
    %43 = arith.addf %40, %42 : vector<32x128xf32>
    %44 = vector.extract_strided_slice %43 {offsets = [0, 0], sizes = [16, 128], strides = [1, 1]} : vector<32x128xf32> to vector<16x128xf32>
    %c0_23 = arith.constant 0 : index
    %c0_24 = arith.constant 0 : index
    %c0_25 = arith.constant 0 : index
    %45 = vector.load %arg5[%c0_23, %c0_24, %c0_25] : memref<2x16x128xf32, #tpu.memory_space<vmem>>, vector<1x16x128xf32>
    %46 = vector.shape_cast %45 : vector<1x16x128xf32> to vector<16x128xf32>
    %47 = vector.shape_cast %44 : vector<16x128xf32> to vector<1x16x128xf32>
    tpu.vector_store %arg5[%c0_23, %c0_24, %c0_25], %47 {strides = array<i32>} : memref<2x16x128xf32, #tpu.memory_space<vmem>>, vector<1x16x128xf32>,
    %48 = vector.extract_strided_slice %43 {offsets = [16, 0], sizes = [16, 128], strides = [1, 1]} : vector<32x128xf32> to vector<16x128xf32>
    %c1_26 = arith.constant 1 : index
    %c0_27 = arith.constant 0 : index
    %c0_28 = arith.constant 0 : index
    %49 = vector.load %arg5[%c1_26, %c0_27, %c0_28] : memref<2x16x128xf32, #tpu.memory_space<vmem>>, vector<1x16x128xf32>
    %50 = vector.shape_cast %49 : vector<1x16x128xf32> to vector<16x128xf32>
    %51 = vector.shape_cast %48 : vector<16x128xf32> to vector<1x16x128xf32>
    tpu.vector_store %arg5[%c1_26, %c0_27, %c0_28], %51 {strides = array<i32>} : memref<2x16x128xf32, #tpu.memory_space<vmem>>, vector<1x16x128xf32>,
    return
  }
  func.func @transform_0(%arg0: i32) -> (i32, i32, i32) {
    %c0_i32 = arith.constant 0 : i32
    %c0_i32_0 = arith.constant 0 : i32
    %c0_i32_1 = arith.constant 0 : i32
    return %arg0, %c0_i32, %c0_i32_0 : i32, i32, i32
  }
  func.func @transform_1(%arg0: i32) -> (i32, i32, i32) {
    %c0_i32 = arith.constant 0 : i32
    %c0_i32_0 = arith.constant 0 : i32
    %c0_i32_1 = arith.constant 0 : i32
    return %arg0, %c0_i32, %c0_i32_0 : i32, i32, i32
  }
  func.func @transform_2(%arg0: i32) -> (i32, i32) {
    %c0_i32 = arith.constant 0 : i32
    %c0_i32_0 = arith.constant 0 : i32
    %c0_i32_1 = arith.constant 0 : i32
    return %c0_i32, %c0_i32_0 : i32, i32
  }
  func.func @transform_3(%arg0: i32) -> (i32, i32) {
    %c0_i32 = arith.constant 0 : i32
    %c0_i32_0 = arith.constant 0 : i32
    %c0_i32_1 = arith.constant 0 : i32
    return %c0_i32, %c0_i32_0 : i32, i32
  }
  func.func @transform_4(%arg0: i32) -> (i32, i32, i32) {
    %c0_i32 = arith.constant 0 : i32
    %c0_i32_0 = arith.constant 0 : i32
    %c0_i32_1 = arith.constant 0 : i32
    return %arg0, %c0_i32, %c0_i32_0 : i32, i32, i32
  }
}

</mosaic_0001>

<bundles_post_ra>
// kernel: global_layer.1
= control target key start
LH: loop header
LB: loop body
LE: loop exit
PB: predicated region body
PF: predicated region fallthrough
CT: control target
= control target key end

     0   :  { %9 = vsyncpa [#allocation3], 0  ;;  %s1246_s0 = inlined_call_operand.vmem [shape: f32[4,16,16], index: 0, kind: input, shape index: {}]   ;;  %s1247_s1 = inlined_call_operand.vmem [shape: f32[4,16,8], index: 1, kind: input, shape index: {}]   ;;  %s1248_s2 = inlined_call_operand.vmem [shape: f32[8,128], index: 2, kind: input, shape index: {}]   ;;  %s1249_s3 = inlined_call_operand.vmem [shape: f32[1,128], index: 3, kind: input, shape index: {}]   ;;  %s1250_s4 = inlined_call_operand.hbm [shape: f32[4,16,128], index: 4, kind: output, shape index: {}]  }
   0x1   :  { %11 = vsyncpa [#allocation3 + $0x1], 0  ;;  %s1117_s15 = smov 0   ;;  %s1119_s16 = smov 0  }
   0x2   :  { %s1121_s17 = smov 0   ;;  %s1123_s18 = smov 0  }
   0x3 LB: > { %s1138_s19 = sadd.s32 4294967295, %s1084_s18   ;;  %s869_s20 = sadd.s32 4294967294, %s1084_s18   ;;  %s1084_s18 = sphi %s1123_s18, %s1256_s18   ;;  %s1080_s17 = sphi %s1121_s17, %s1255_s17   ;;  %s1076_s16 = sphi %s1119_s16, %s1254_s16   ;;  %s1072_s15 = sphi %s1117_s15, %s1253_s15  }
   0x4   : > { %s1142_s21 = sadd.s32 1, %s1084_s18   ;;  %s118_s22 = sadd.s32 1, %s1080_s17 }
   0x5   : > { %s115_s23 = ssub.s32 %s1084_s18, %s1142_s21  ;;  %p128_p0 = scmp.ne.s32.totalorder %s1080_s17, %s1076_s16 }
   0x6   : > { %p116_p1 = scmp.eq.s32.totalorder %s115_s23, 0  ;;  %p129_p2 = scmp.eq.s32.totalorder %s1138_s19, 1 }
   0x7   : > { %p134_p3 = scmp.ne.s32.totalorder %s1076_s16, %s1072_s15  ;;  %p135_p4 = scmp.eq.s32.totalorder %s869_s20, 1 }
   0x8   : > { %s1153_s24 = scalar_select %p116_p1, %s1080_s17, %s118_s22  }
   0x9   : > { %p1155_p5 = por %p129_p2, %p128_p0  ;;  %p1159_p6 = por %p135_p4, %p134_p3 }
   0xa   : > { %p872_p7 = scmp.ge.s32.totalorder %s1084_s18, 1  ;;  %p179_p8 = scmp.lt.s32.totalorder %s1084_s18, 3 }
   0xc   : > { %p180_p9 = pnand %p872_p7, %p179_p8 }
   0xd   : > { %s874_s27 = sshll.u32 (!%p180_p9), %s1138_s19, 1  ;;  %s209_s11 = sand.u32 (!%p180_p9), 1, %s1076_s16  }
   0xe   : > { %183 = sbr.rel (%p180_p9) target bundleno = 908 (0x38c), region = 36  ;;  %p213_p10 = scmp.lt.s32.totalorder (!%p180_p9), %s874_s27, 3 }
   0xf   : > { %s873_s12 = sshll.u32 (!%p180_p9), %s209_s11, 5  ;;  %s912_s23 = sshll.u32 (!%p180_p9), %s1138_s19, 9 }
  0x10   : > { %s211_s20 = scalar_lea.vmem (!%p180_p9), [#allocation2], %s873_s12  ;;  %s1204_s29 = scalar_lea.hbm (!%p180_p9), %s1250_s4, %s912_s23 }
  0x11   : > { %s795_s22 = sshll.u32 (!%p180_p9), %s211_s20, 4  ;;  %s1206_s30 = scalar_lea.sflag (!%p180_p9), [#allocation3], %s209_s11  ;;  %s1199_s22 = int_to_ptr.vmem [resolvable:$true] %s795_s22 }
  0x12   : > { %s1024_s19 = scalar_lea.vmem (!%p180_p9), %s1199_s22, 512 }
  0x13   : > { %v227_v0 = vlaneseq  ;;  %s1258_s27 = smov (!%p213_p10, %s874_s27), 3  ;;  %v1086_v8 = vmov 1.0   ;;  %v1087_v9 = vmov 0.0   ;;  %vm276_vm6 = vcmask 130048   ;;  %v669_v43 = vld [vmem:[%s1248_s2] sm:$0xff]  ;;  %p1025_p11 = scmp.ne.s32.totalorder %s1199_s22, %s1024_s19 }
  0x14   : > { %s909_s28 = sshll.u32 %s1258_s27, 4  ;;  %934 = vmatprep.subr.mxu1 %v1086_v8  ;;  %948 = vmatprep.subr.mxu0 %v1086_v8  ;;  %v1088_v22 = vmov 0   ;;  %vm677_vm7 = vcmask 64512   ;;  %v896_v52 = vld [vmem:[%s1249_s3] ss:$0 sm:$0xff] }
  0x15   : > { %v228_v1 = vshrl.u32 %v227_v0, 7  ;;  %v231_v2 = vand.u32 127, %v227_v0  ;;  %s217_s5 = scalar_lea.vmem %s1246_s0, %s909_s28  ;;  %935 = vmatpush3.msra.mxu1 %v1086_v8  ;;  %949 = vmatpush3.msra.mxu0 %v1086_v8  ;;  %s224_s8 = scalar_lea.vmem %s1247_s1, %s909_s28 }
  0x16   : > { %v886_v4 = vld [vmem:[%s217_s5 + $0x10] sm:$0xff]  ;;  %v234_v5 = vld [vmem:[%s217_s5] sm:$0xff]  ;;  %v887_v6 = vld [vmem:[%s217_s5 + $0x18] sm:$0xff]  ;;  %936 = vmatprep.subr.mxu1 %v1086_v8  ;;  %950 = vmatprep.subr.mxu0 %v1086_v8  ;;  %p1026_p12 = pnand %p1025_p11, %p1155_p5 }
  0x17   : > { %v229_v3 = vadd.s32 8, %v228_v1  ;;  %vm232_vm0 = vcmp.eq.s32.totalorder %v228_v1, %v231_v2  ;;  %vm454_vm1 = vcmp.ne.f32.partialorder %v886_v4, 0.0  ;;  %vm236_vm2 = vcmp.ne.f32.partialorder %v234_v5, 0.0  ;;  %v235_v7 = vld [vmem:[%s217_s5 + $0x8] sm:$0xff]  ;;  %937 = vmatpush3.msra.mxu1 %v1086_v8  ;;  %951 = vmatpush3.msra.mxu0 %v1086_v8  ;;  %v360_v35 = vld [vmem:[%s224_s8] sm:$0xff]  ;;  %v893_v36 = vld [vmem:[%s224_s8 + $0x18] sm:$0xff] }
  0x18   : > { %vm455_vm4 = vcmp.ne.f32.partialorder %v887_v6, 0.0  ;;  %v888_v10 = vsel %vm454_vm1, 1.0, %v1087_v9  ;;  %v880_v11 = vsel %vm236_vm2, 1.0, %v1087_v9  ;;  %vm237_vm5 = vcmp.ne.f32.partialorder %v235_v7, 0.0  ;;  %v361_v31 = vld [vmem:[%s224_s8 + $0x8] sm:$0xff]  ;;  %v892_v39 = vld [vmem:[%s224_s8 + $0x10] sm:$0xff]  ;;  %962 = vmatprep.subr.mxu0 %v669_v43  ;;  %p1027_p13 = pneg %p1026_p12 }
  0x19   : > { %vm233_vm3 = vcmp.eq.s32.totalorder %v229_v3, %v231_v2  ;;  %v889_v12 = vsel %vm455_vm4, 1.0, %v1087_v9  ;;  %v460_v13 = vsel %vm232_vm0, 1.0, %v888_v10  ;;  %v242_v14 = vsel %vm232_vm0, 1.0, %v880_v11  ;;  %s1089_s5 = smov [#allocation2]  }
  0x1a   : > { %v881_v15 = vsel %vm237_vm5, 1.0, %v1087_v9  ;;  %462 = vxpose.xlu1.b32.start [1/2] (short) (narrow) %v460_v13, 16  ;;  %244 = vxpose.xlu0.b32.start [1/2] (short) (narrow) %v242_v14, 16  ;;  %v461_v16 = vsel %vm233_vm3, 1.0, %v889_v12  ;;  %s1028_s6 = sshll.u32 %s1089_s5, 4  ;;  %s1029_s6 = int_to_ptr.vmem [resolvable:$false] %s1028_s6 }
  0x1b   : > { %v243_v17 = vsel %vm233_vm3, 1.0, %v881_v15  ;;  %s1030_s7 = scalar_lea.vmem %s1029_s6, 1024  ;;  %p1031_p0 = scmp.lt.s32.totalorder %s1199_s22, %s1029_s6 }
  0x1c   : > { %p1032_p1 = scmp.lt.s32.totalorder %s1030_s7, %s1024_s19 }
  0x1e   : > { %463 = vxpose.xlu1.b32.end [2/2] (short) (narrow) %v461_v16, 16  ;;  %245 = vxpose.xlu0.b32.end [2/2] (short) (narrow) %v243_v17, 16  ;;  %p1033_p2 = por %p1032_p1, %p1031_p0 }
  0x20   : > { %p1034_p3 = pnand %p1033_p2, %p1027_p13 }
  0x3c   : > { %1015 = vset.pattern.permute.xlu1 %v1088_v22 }
  0x47   : > { %1014 = vset.pattern.permute.xlu0 %v1088_v22 }
  0x96   : > { %v478_v18 = vpop.trf.xlu1  ;;  %v260_v19 = vpop.trf.xlu0 }
  0x97   : > { %952 = vmatprep.mubr.msk.f32.mxu0 %vm276_vm6, %v478_v18  ;;  %938 = vmatprep.mubr.msk.f32.mxu1 %vm276_vm6, %v260_v19 }
  0x9a   : > { %v479_v20 = vpop.trf.xlu1  ;;  %v261_v21 = vpop.trf.xlu0 }
  0x9b   : > { %939 = vmatmul.mubr.msk.f32.vlgmr.msra.gmra.mxu1 %vm276_vm6, %v261_v21  ;;  %953 = vmatmul.mubr.msk.f32.vlgmr.msra.gmra.mxu0 %vm276_vm6, %v479_v20 }
  0x9c   : > { %945 = vmatprep.mubr.msk.f32.mxu1 %vm276_vm6, %v260_v19  ;;  %963 = vmatpush3.msra.mxu0 %v669_v43 }
 0x15b   : > { %v940_v23 = vpop.f32.mrf.mxu1  ;;  %v954_v24 = vpop.f32.mrf.mxu0 }
 0x15c   : > { %1016 = vrsqrt.f32 %v940_v23 }
 0x15d   : > { %1018 = vrsqrt.f32 %v954_v24  ;;  %v349_v25 = vpop.f32.mrf.mxu1  ;;  %v566_v26 = vpop.f32.mrf.mxu0 }
 0x15e   : > { %1020 = vrsqrt.f32 %v349_v25 }
 0x15f   : > { %1022 = vrsqrt.f32 %v566_v26 }
 0x169   : > { %v1017_v27 = vpop.eup %1016 }
 0x16a   : > { %v1019_v28 = vpop.eup %1018  ;;  %369 = vperm.xlu0 %1014, %v1017_v27  }
 0x16b   : > { %587 = vperm.xlu1 %1015, %v1019_v28   ;;  %v1021_v29 = vpop.eup %1020 }
 0x16c   : > { %v1023_v30 = vpop.eup %1022 }
 0x16f   : > { %364 = vperm.xlu1 %1015, %v1021_v29  }
 0x173   : > { %582 = vperm.xlu1 %1015, %v1023_v30  }
 0x1e5   : > { %v370_v32 = vpop.permute.xlu0 %369 }
 0x1e6   : > { %v588_v33 = vpop.permute.xlu1 %587  ;;  %v373_v34 = vmul.f32 %v370_v32, %v361_v31 }
 0x1e7   : > { %v591_v40 = vmul.f32 %v893_v36, %v588_v33 }
 0x1e8   : > { %941 = vmatprep.subr.mxu1 %v373_v34 }
 0x1e9   : > { %942 = vmatpush3.msra.mxu1 %v373_v34 }
 0x1ea   : > { %v365_v37 = vpop.permute.xlu1 %364 }
 0x1eb   : > { %v372_v38 = vmul.f32 %v365_v37, %v360_v35 }
 0x1ed   : > { %943 = vmatprep.subr.mxu1 %v372_v38 }
 0x1ee   : > { %944 = vmatpush3.msra.mxu1 %v372_v38  ;;  %v583_v41 = vpop.permute.xlu1 %582 }
 0x1ef   : > { %v590_v42 = vmul.f32 %v892_v39, %v583_v41  ;;  %946 = vmatmul.mubr.msk.f32.vlgmr.msra.gmra.mxu1 %vm276_vm6, %v261_v21  ;;  %955 = vmatprep.subr.mxu1 %v591_v40 }
 0x1f0   : > { %956 = vmatpush3.msra.mxu1 %v591_v40  ;;  %959 = vmatprep.mubr.msk.f32.mxu1 %vm276_vm6, %v478_v18 }
 0x1f1   : > { %957 = vmatprep.subr.mxu1 %v590_v42 }
 0x1f2   : > { %958 = vmatpush3.msra.mxu1 %v590_v42 }
 0x1f3   : > { %960 = vmatmul.mubr.msk.f32.vlgmr.msra.gmra.mxu1 %vm276_vm6, %v479_v20 }
 0x2af   : > { %v947_v44 = vpop.f32.mrf.mxu1 }
 0x2b0   : > { %v450_v47 = vmul.f32 %v947_v44, %v370_v32 }
 0x2b1   : > { %v440_v45 = vpop.f32.mrf.mxu1 }
 0x2b2   : > { %v449_v46 = vmul.f32 %v440_v45, %v365_v37 }
 0x2b3   : > { %v961_v48 = vpop.f32.mrf.mxu1 }
 0x2b4   : > { %964 = vmatprep.mubr.msk.f32.mxu0 %vm677_vm7, %v449_v46  ;;  %v668_v51 = vmul.f32 %v961_v48, %v588_v33 }
 0x2b5   : > { %v658_v49 = vpop.f32.mrf.mxu1  ;;  %965 = vmatmul.mubr.msk.f32.vlgmr.msra.gmra.mxu0 %vm677_vm7, %v450_v47 }
 0x2b6   : > { %v667_v50 = vmul.f32 %v658_v49, %v583_v41 }
 0x2b8   : > { %967 = vmatprep.mubr.msk.f32.mxu0 %vm677_vm7, %v667_v50 }
 0x2b9   : > { %968 = vmatmul.mubr.msk.f32.gmra.mxu0 %vm677_vm7, %v668_v51 }
 0x375   : > { %v966_v53 = vpop.f32.mrf.mxu0 }
 0x376   : > { %v762_v54 = vadd.f32 %v966_v53, %v896_v52 }
 0x377   : > { %v756_v55 = vpop.f32.mrf.mxu0 }
 0x378   : > { %776 = vst [vmem:[%s211_s20 + $0x8] sm:$0xff] %v762_v54  ;;  %v757_v56 = vadd.f32 %v896_v52, %v756_v55 }
 0x379   : > { %v969_v57 = vpop.f32.mrf.mxu0 }
 0x37a   : > { %775 = vst [vmem:[%s211_s20] sm:$0xff] %v757_v56  ;;  %v772_v58 = vadd.f32 %v969_v57, %v896_v52 }
 0x37b   : > { %v766_v59 = vpop.f32.mrf.mxu0 }
 0x37c   : > { %902 = vst [vmem:[%s211_s20 + $0x18] sm:$0xff] %v772_v58  ;;  %v767_v60 = vadd.f32 %v896_v52, %v766_v59 }
 0x37e   : > { %901 = vst [vmem:[%s211_s20 + $0x10] sm:$0xff] %v767_v60 }
 0x37f   : > { %1037 = shalt.err (!%p1034_p3)
}
 0x380   : > { %s1038_s8 = scalar_lea.hbm %s1204_s29, 512  ;;  %s1042_s11 = scalar_lea.hbm %s1250_s4, 1024 }
 0x381   : > { %p1039_p4 = scmp.ne.s32.totalorder %s1204_s29, %s1038_s8  ;;  %p1043_p9 = scmp.lt.s32.totalorder %s1204_s29, %s1250_s4 }
 0x382   : > { %p1044_p10 = scmp.lt.s32.totalorder %s1042_s11, %s1038_s8 }
 0x383   : > { %p1040_p7 = pnand %p1039_p4, %p1155_p5 }
 0x384   : > { %p1045_p11 = por %p1044_p10, %p1043_p9 }
 0x385   : > { %p1041_p8 = pneg %p1040_p7 }
 0x387   : > { %p1046_p12 = pnand %p1045_p11, %p1041_p8 }
 0x389   : > { %1049 = shalt.err (!%p1046_p12)
}
 0x38a   : > { %s1090_s14 = smov 128   ;;  %s1091_s20 = smov 8  }
 0x38b   : > { %970 = dma.vmem_to_hbm [thread:$0]  (%p1155_p5), %s1199_s22, 512, %s1204_s29, %s1206_s30, %s1090_s14, %s1090_s14, %s1091_s20  }
 0x38c PF: > { %p976_p13 = scmp.ge.s32.totalorder %s1084_s18, 2  ;;  %s810_s23 = sand.u32 1, %s1072_s15  }
 0x38d   : > { %s811_s27 = scalar_lea.sflag [#allocation3], %s810_s23 }
 0x38e   : > { %p973_p0 = pnand %p976_p13, %p1159_p6 }
 0x390   : > { %p974_p1 = pneg %p973_p0 }
 0x392   : > { %1067 = dma.done.wait (%p974_p1), %s811_s27, 512  }
 0x393   : > { %1069 = vsyncadd (%p974_p1), %s811_s27, 4294966784  ;;  %p14_p2 = scmp.ge.s32.totalorder %s1142_s21, 4   ;;  %s1253_s15 = smov %s1076_s16 }
 0x394   : > { %s1254_s16 = smov %s1080_s17  ;;  %s1255_s17 = smov %s1153_s24 }
 0x395   : > { %s1256_s18 = smov %s1142_s21  ;;  %16 = sbr.rel (!%p14_p2) target bundleno = 3 (0x3), region = 77 }
 0x39a   :  { %816 = vsyncpa [#allocation3], 1 }
 0x39b   :  { %818 = vsyncpa [#allocation3 + $0x1], 1 }

</bundles_post_ra>
